<compile_context>
chip_gen: v7x
topology: tpu7x:2x2x1
jax: 0.10.0
libtpu: 0.0.40
codegen_flags: <defaults>
</compile_context>

<pallas_src>
import jax
import jax.numpy as jnp
from jax.experimental import pallas as pl
from jax.experimental.pallas import tpu as pltpu

LANE = 128        # lane width (last-dim tile)
SUBLANE_BF16 = 16 # bf16 sublane tile (second-to-last dim)


def _round_up(x, m):
    return ((x + m - 1) // m) * m


def _ae_fused_kernel(*refs):
    """refs = (x_ref, w0, b0, w1, b1, ..., w{L-1}, b{L-1}, o_ref).

    x_ref: bf16 [TM, Kp0]; w_l: bf16 [Kp_l, Np_l] ([in, out] layout);
    b_l: f32 [1, Np_l]; o_ref: f32 [TM, Np_last].
    Activation stays on-chip (vregs/VMEM) across the whole layer stack.
    """
    num_layers = (len(refs) - 2) // 2
    x_ref, o_ref = refs[0], refs[-1]
    act = x_ref[...]                              # bf16
    # Static unroll: L is tiny and compile-time known (per-layer shapes differ,
    # so a dynamic loop over a stacked slab is not applicable here).
    for l in range(num_layers):
        w_ref = refs[1 + 2 * l]
        b_ref = refs[2 + 2 * l]
        y = jax.lax.dot_general(
            act, w_ref[...],
            dimension_numbers=(((1,), (0,)), ((), ())),   # contract K with K
            preferred_element_type=jnp.float32,           # f32 MXU accumulator
        )
        y = jnp.maximum(y + b_ref[...], 0.0)              # f32 epilogue
        # Cast back to bf16 for the next matmul; keep f32 for the final store.
        act = y.astype(jnp.bfloat16) if l + 1 < num_layers else y
    o_ref[...] = act.astype(o_ref.dtype)                  # lane-dense full store


def prepare_params(params):
    """One-time packing of nn.Linear params (w[out,in], b[out]).

    Pre-transposes to [in, out], zero-pads each layer independently to
    lane-aligned [Kp_l, Np_l], casts weights to bf16 (bias stays f32).
    Zero padding is semantics-preserving: padded rows/cols/lanes stay zero
    through bias-add (zero bias lanes) and ReLU.
    """
    in_dim = params[0][0].shape[1]
    widths = [in_dim] + [w.shape[0] for w, _ in params]
    padded = [_round_up(w, LANE) for w in widths]

    packed = []
    for l, (w, b) in enumerate(params):
        kp, np_l = padded[l], padded[l + 1]
        w_p = (jnp.zeros((kp, np_l), jnp.bfloat16)
                  .at[:w.shape[1], :w.shape[0]].set(w.T.astype(jnp.bfloat16)))
        b_p = (jnp.zeros((1, np_l), jnp.float32)
                  .at[0, :b.shape[0]].set(b.astype(jnp.float32)))
        packed.append((w_p, b_p))
    return {"packed": tuple(packed),
            "widths": tuple(widths),
            "padded": tuple(padded)}


def make_ae_forward(params):
    """Returns a jitted forward fn closing over pre-packed weights."""
    prep = prepare_params(params)
    widths, padded = prep["widths"], prep["padded"]
    L = len(prep["packed"])
    in_dim, out_dim = widths[0], widths[-1]
    kp0, np_last = padded[0], padded[-1]

    flat_wb = []
    for w_p, b_p in prep["packed"]:
        flat_wb += [w_p, b_p]

    def fwd(x, *wb):
        M = x.shape[0]
        # Batch tiling: small batches run as a single grid step; large batches
        # get a parallel batch grid with weights resident across iterations.
        if M <= 256:
            Mp = _round_up(max(M, SUBLANE_BF16), SUBLANE_BF16)
            TM = Mp
        else:
            TM = 256
            Mp = _round_up(M, TM)

        # Pad activations into a lane-dense bf16 [Mp, Kp0] slab.
        x_p = (jnp.zeros((Mp, kp0), jnp.bfloat16)
                  .at[:M, :in_dim].set(x.astype(jnp.bfloat16)))

        in_specs = [pl.BlockSpec((TM, kp0), lambda i: (i, 0))]
        for l in range(L):
            kp, np_l = padded[l], padded[l + 1]
            # Constant block index -> weights/bias stay VMEM-resident across
            # batch-grid iterations (no re-DMA).
            in_specs.append(pl.BlockSpec((kp, np_l), lambda i: (0, 0)))
            in_specs.append(pl.BlockSpec((1, np_l), lambda i: (0, 0)))
        out_spec = pl.BlockSpec((TM, np_last), lambda i: (i, 0))

        # Explicit VMEM budget: packed weights/biases + double-buffered
        # activation / output tiles, with headroom.
        vmem = 2 * TM * kp0 * 2 + 2 * TM * np_last * 4
        for l in range(L):
            vmem += 2 * (padded[l] * padded[l + 1] * 2 + padded[l + 1] * 4)
        vmem_limit = max(min(2 * vmem + (4 << 20), 100 << 20), 16 << 20)

        out_p = pl.pallas_call(
            _ae_fused_kernel,
            out_shape=jax.ShapeDtypeStruct((Mp, np_last), jnp.float32),
            grid=(Mp // TM,),
            in_specs=in_specs,
            out_specs=out_spec,
            compiler_params=pltpu.CompilerParams(
                dimension_semantics=("parallel",),
                vmem_limit_bytes=vmem_limit),
        )(x_p, *wb)
        return out_p[:M, :out_dim]

    jitted = jax.jit(fwd)
    return lambda x: jitted(x, *flat_wb)


def init_ae_params(layer_sizes, key):
    """nn.Linear-style init: weight (out, in), bias (out,)."""
    params = []
    for i in range(len(layer_sizes) - 1):
        fan_in, fan_out = layer_sizes[i], layer_sizes[i + 1]
        key, kw, kb = jax.random.split(key, 3)
        bound = 1.0 / jnp.sqrt(jnp.float32(fan_in))
        w = jax.random.uniform(kw, (fan_out, fan_in), jnp.float32, -bound, bound)
        b = jax.random.uniform(kb, (fan_out,), jnp.float32, -bound, bound)
        params.append((w, b))
    return params


if __name__ == "__main__":
    layer_sizes = [16, 32, 8]   # small synthetic AE: 16 -> 32 -> 8
    batch = 8

    key = jax.random.PRNGKey(0)
    key, kx = jax.random.split(key)
    x = jax.random.normal(kx, (batch, layer_sizes[0]), dtype=jnp.float32)
    params = init_ae_params(layer_sizes, key)

    fwd = make_ae_forward(params)
    out = jax.block_until_ready(fwd(x))

    # Reference in plain JAX f32 (matches PyTorch AE.forward).
    ref = x
    for w, b in params:
        ref = jnp.maximum(ref @ w.T + b, 0.0)

    assert out.shape == (batch, layer_sizes[-1])
    # Kernel uses bf16 weights/activations with f32 accumulation -> compare
    # against the f32 reference with a bf16-appropriate tolerance.
    assert jnp.allclose(out, ref, atol=3e-2, rtol=3e-2), (
        float(jnp.max(jnp.abs(out - ref))))

    print("KERNEL_OK")
</pallas_src>

<mosaic_0001>
module attributes {stable_mosaic.version = 11 : i64} {
  func.func @_ae_fused_kernel(%arg0: i32, %arg1: memref<16x128xbf16, #tpu.memory_space<vmem>>, %arg2: memref<128x128xbf16, #tpu.memory_space<vmem>>, %arg3: memref<1x128xf32, #tpu.memory_space<vmem>>, %arg4: memref<128x128xbf16, #tpu.memory_space<vmem>>, %arg5: memref<1x128xf32, #tpu.memory_space<vmem>>, %arg6: memref<16x128xf32, #tpu.memory_space<vmem>>) attributes {dimension_semantics = [#tpu.dimension_semantics<parallel>], iteration_bounds = array<i64: 1>, scalar_prefetch = 0 : i64, scratch_operands = 0 : i64, tpu.core_type = #tpu.core_type<tc>, window_params = [{transform_indices = @transform_0, window_bounds = array<i64: 16, 128>}, {pipeline_mode = #tpu.pipeline_mode<synchronous>, transform_indices = @transform_1, window_bounds = array<i64: 128, 128>}, {pipeline_mode = #tpu.pipeline_mode<synchronous>, transform_indices = @transform_2, window_bounds = array<i64: 1, 128>}, {pipeline_mode = #tpu.pipeline_mode<synchronous>, transform_indices = @transform_3, window_bounds = array<i64: 128, 128>}, {pipeline_mode = #tpu.pipeline_mode<synchronous>, transform_indices = @transform_4, window_bounds = array<i64: 1, 128>}, {transform_indices = @transform_5, window_bounds = array<i64: 16, 128>}]} {
    %c0 = arith.constant 0 : index
    %c0_0 = arith.constant 0 : index
    %0 = vector.load %arg1[%c0, %c0_0] : memref<16x128xbf16, #tpu.memory_space<vmem>>, vector<16x128xbf16>
    %c0_1 = arith.constant 0 : index
    %c0_2 = arith.constant 0 : index
    %1 = vector.load %arg2[%c0_1, %c0_2] : memref<128x128xbf16, #tpu.memory_space<vmem>>, vector<128x128xbf16>
    %cst = arith.constant dense<0.000000e+00> : vector<16x128xf32>
    %2 = tpu.matmul %0, %1, %cst {dimension_numbers = #tpu.dot_dimension_numbers<[1], [0], [0], [1], [0, 0, 1, 1], [], []>} : vector<16x128xbf16>, vector<128x128xbf16>, vector<16x128xf32> -> vector<16x128xf32>
    %c0_3 = arith.constant 0 : index
    %c0_4 = arith.constant 0 : index
    %3 = vector.load %arg3[%c0_3, %c0_4] : memref<1x128xf32, #tpu.memory_space<vmem>>, vector<1x128xf32>
    %4 = vector.broadcast %3 : vector<1x128xf32> to vector<16x128xf32>
    %5 = arith.addf %2, %4 : vector<16x128xf32>
    %cst_5 = arith.constant 0.000000e+00 : f32
    %6 = vector.broadcast %cst_5 : f32 to vector<16x128xf32>
    %7 = arith.maximumf %5, %6 : vector<16x128xf32>
    %8 = arith.truncf %7 : vector<16x128xf32> to vector<16x128xbf16>
    %c0_6 = arith.constant 0 : index
    %c0_7 = arith.constant 0 : index
    %9 = vector.load %arg4[%c0_6, %c0_7] : memref<128x128xbf16, #tpu.memory_space<vmem>>, vector<128x128xbf16>
    %cst_8 = arith.constant dense<0.000000e+00> : vector<16x128xf32>
    %10 = tpu.matmul %8, %9, %cst_8 {dimension_numbers = #tpu.dot_dimension_numbers<[1], [0], [0], [1], [0, 0, 1, 1], [], []>} : vector<16x128xbf16>, vector<128x128xbf16>, vector<16x128xf32> -> vector<16x128xf32>
    %c0_9 = arith.constant 0 : index
    %c0_10 = arith.constant 0 : index
    %11 = vector.load %arg5[%c0_9, %c0_10] : memref<1x128xf32, #tpu.memory_space<vmem>>, vector<1x128xf32>
    %12 = vector.broadcast %11 : vector<1x128xf32> to vector<16x128xf32>
    %13 = arith.addf %10, %12 : vector<16x128xf32>
    %cst_11 = arith.constant 0.000000e+00 : f32
    %14 = vector.broadcast %cst_11 : f32 to vector<16x128xf32>
    %15 = arith.maximumf %13, %14 : vector<16x128xf32>
    %c0_12 = arith.constant 0 : index
    %c0_13 = arith.constant 0 : index
    %16 = vector.load %arg6[%c0_12, %c0_13] : memref<16x128xf32, #tpu.memory_space<vmem>>, vector<16x128xf32>
    tpu.vector_store %arg6[%c0_12, %c0_13], %15 {strides = array<i32>} : memref<16x128xf32, #tpu.memory_space<vmem>>, vector<16x128xf32>,
    return
  }
  func.func @transform_0(%arg0: i32) -> (i32, i32) {
    %c0_i32 = arith.constant 0 : i32
    %c0_i32_0 = arith.constant 0 : i32
    return %arg0, %c0_i32 : i32, i32
  }
  func.func @transform_1(%arg0: i32) -> (i32, i32) {
    %c0_i32 = arith.constant 0 : i32
    %c0_i32_0 = arith.constant 0 : i32
    %c0_i32_1 = arith.constant 0 : i32
    return %c0_i32, %c0_i32_0 : i32, i32
  }
  func.func @transform_2(%arg0: i32) -> (i32, i32) {
    %c0_i32 = arith.constant 0 : i32
    %c0_i32_0 = arith.constant 0 : i32
    %c0_i32_1 = arith.constant 0 : i32
    return %c0_i32, %c0_i32_0 : i32, i32
  }
  func.func @transform_3(%arg0: i32) -> (i32, i32) {
    %c0_i32 = arith.constant 0 : i32
    %c0_i32_0 = arith.constant 0 : i32
    %c0_i32_1 = arith.constant 0 : i32
    return %c0_i32, %c0_i32_0 : i32, i32
  }
  func.func @transform_4(%arg0: i32) -> (i32, i32) {
    %c0_i32 = arith.constant 0 : i32
    %c0_i32_0 = arith.constant 0 : i32
    %c0_i32_1 = arith.constant 0 : i32
    return %c0_i32, %c0_i32_0 : i32, i32
  }
  func.func @transform_5(%arg0: i32) -> (i32, i32) {
    %c0_i32 = arith.constant 0 : i32
    %c0_i32_0 = arith.constant 0 : i32
    return %arg0, %c0_i32 : i32, i32
  }
}

</mosaic_0001>

<bundles_post_ra>
// kernel: fwd.1
= control target key start
LH: loop header
LB: loop body
LE: loop exit
PB: predicated region body
PF: predicated region fallthrough
CT: control target
= control target key end

     0   :  { %10 = vsyncpa [#allocation3], 0  ;;  %s517_s0 = inlined_call_operand.vmem [shape: bf16[16,128], index: 0, kind: input, shape index: {}]   ;;  %s518_s1 = inlined_call_operand.hbm [shape: bf16[128,128], index: 1, kind: input, shape index: {}]   ;;  %s519_s2 = inlined_call_operand.vmem [shape: f32[1,128], index: 2, kind: input, shape index: {}]   ;;  %s520_s3 = inlined_call_operand.hbm [shape: bf16[128,128], index: 3, kind: input, shape index: {}]   ;;  %s521_s4 = inlined_call_operand.vmem [shape: f32[1,128], index: 4, kind: input, shape index: {}]   ;;  %s522_s5 = inlined_call_operand.vmem [shape: f32[16,128], index: 5, kind: output, shape index: {}]  }
   0x1   :  { %11 = vsyncpa [#allocation5], 0  ;;  %s442_s18 = smov [#allocation2]   ;;  %s394_s22 = scalar_lea.hbm %s518_s1, 1024 }
   0x2   :  { %s19_s19 = sshll.u32 %s442_s18, 4  ;;  %p395_p0 = scmp.ne.s32.totalorder %s518_s1, %s394_s22  ;;  %s20_s19 = int_to_ptr.vmem [resolvable:$true] %s19_s19 }
   0x3   :  { %p398_p1 = scmp.lt.u32.totalorder %s394_s22, %s518_s1 }
   0x5   :  { %p400_p2 = pnand %p398_p1, %p395_p0 }
   0x7   :  { %403 = shalt.err (!%p400_p2)
}
   0x8   :  { %s404_s27 = scalar_lea.vmem %s20_s19, 1024  ;;  %p409_p4 = scmp.lt.s32.totalorder %s20_s19, %s20_s19 }
   0x9   :  { %p405_p3 = scmp.ne.s32.totalorder %s20_s19, %s404_s27  ;;  %p410_p5 = scmp.lt.s32.totalorder %s404_s27, %s404_s27 }
   0xb   :  { %p411_p6 = por %p410_p5, %p409_p4 }
   0xd   :  { %p412_p7 = pnand %p411_p6, %p405_p3 }
   0xf   :  { %415 = shalt.err (!%p412_p7)
}
  0x10   :  { %s443_s28 = smov 64   ;;  %s444_s29 = smov 4  }
  0x11   :  { %25 = dma.hbm_to_vmem [thread:$0]  %s518_s1, 1024, %s20_s19, [#allocation3], %s443_s28, %s443_s28, %s444_s29  }
  0x12   :  { %s445_s7 = smov [#allocation4]   ;;  %s416_s11 = scalar_lea.hbm %s520_s3, 1024 }
  0x13   :  { %s33_s8 = sshll.u32 %s445_s7, 4  ;;  %p417_p8 = scmp.ne.s32.totalorder %s520_s3, %s416_s11  ;;  %s34_s8 = int_to_ptr.vmem [resolvable:$true] %s33_s8 }
  0x14   :  { %p420_p9 = scmp.lt.u32.totalorder %s416_s11, %s520_s3 }
  0x16   :  { %p422_p10 = pnand %p420_p9, %p417_p8 }
  0x18   :  { %425 = shalt.err (!%p422_p10)
}
  0x19   :  { %s426_s16 = scalar_lea.vmem %s34_s8, 1024  ;;  %p431_p12 = scmp.lt.s32.totalorder %s34_s8, %s34_s8 }
  0x1a   :  { %p427_p11 = scmp.ne.s32.totalorder %s34_s8, %s426_s16  ;;  %p432_p13 = scmp.lt.s32.totalorder %s426_s16, %s426_s16 }
  0x1c   :  { %p433_p0 = por %p432_p13, %p431_p12 }
  0x1e   :  { %p434_p1 = pnand %p433_p0, %p427_p11 }
  0x20   :  { %437 = shalt.err (!%p434_p1)
}
  0x21   :  { %39 = dma.hbm_to_vmem [thread:$0]  %s520_s3, 1024, %s34_s8, [#allocation5], %s443_s28, %s443_s28, %s444_s29  }
  0x22   :  { %438 = dma.done.wait [#allocation3], 1024  }
  0x23   :  { %439 = vsyncadd [#allocation3], 4294966272 }
  0x24   :  { %440 = dma.done.wait [#allocation5], 1024  }
  0x25   :  { %441 = vsyncadd [#allocation5], 4294966272  ;;  %v446_v0 = vmov 0.0   ;;  %vm447_vm0 = vmmov 0   ;;  %v377_v1 = vld [vmem:[#allocation2] sm:$0xff]   ;;  %v378_v2 = vld [vmem:[#allocation2 + $0x8] sm:$0xff]  }
  0x26   :  { %331 = vmatprep.subr.bf16.mxu0 %v446_v0  ;;  %347 = vmatprep.mubr.msk.bf16.mxu0 %vm447_vm0, %v446_v0  ;;  %v379_v3 = vld [vmem:[#allocation2 + $0x10] sm:$0xff]   ;;  %v386_v4 = vld [vmem:[#allocation4] sm:$0xff]   ;;  %v380_v5 = vld [vmem:[#allocation2 + $0x18] sm:$0xff]  }
  0x27   :  { %351 = vmatprep.subr.bf16.mxu1 %v446_v0  ;;  %367 = vmatprep.mubr.msk.bf16.mxu1 %vm447_vm0, %v446_v0  ;;  %v387_v6 = vld [vmem:[#allocation4 + $0x8] sm:$0xff]   ;;  %v381_v7 = vld [vmem:[#allocation2 + $0x20] sm:$0xff]   ;;  %v388_v8 = vld [vmem:[#allocation4 + $0x10] sm:$0xff]  }
  0x28   :  { %332 = vmatpush3.bf16.msra.mxu0 %v377_v1  ;;  %352 = vmatpush3.bf16.msra.mxu1 %v386_v4  ;;  %v382_v9 = vld [vmem:[#allocation2 + $0x28] sm:$0xff]   ;;  %v389_v10 = vld [vmem:[#allocation4 + $0x18] sm:$0xff]   ;;  %v383_v11 = vld [vmem:[#allocation2 + $0x30] sm:$0xff]  }
  0x29   :  { %333 = vmatprep.subr.bf16.mxu0 %v446_v0  ;;  %353 = vmatprep.subr.bf16.mxu1 %v446_v0  ;;  %v390_v12 = vld [vmem:[#allocation4 + $0x20] sm:$0xff]   ;;  %v384_v13 = vld [vmem:[#allocation2 + $0x38] sm:$0xff]   ;;  %v391_v14 = vld [vmem:[#allocation4 + $0x28] sm:$0xff]  }
  0x2a   :  { %v385_v15 = vld [vmem:[%s517_s0] sm:$0xff]   ;;  %v392_v16 = vld [vmem:[#allocation4 + $0x30] sm:$0xff]   ;;  %v393_v17 = vld [vmem:[#allocation4 + $0x38] sm:$0xff]  }
  0x2b   :  { %v294_v18 = vld [vmem:[%s519_s2] ss:$0 sm:$0xff] }
  0x2c   :  { %334 = vmatpush3.bf16.msra.mxu0 %v378_v2  ;;  %354 = vmatpush3.bf16.msra.mxu1 %v387_v6  ;;  %v304_v28 = vld [vmem:[%s521_s4] ss:$0 sm:$0xff] }
  0x2d   :  { %335 = vmatprep.subr.bf16.mxu0 %v446_v0  ;;  %355 = vmatprep.subr.bf16.mxu1 %v446_v0 }
  0x30   :  { %336 = vmatpush3.bf16.msra.mxu0 %v379_v3  ;;  %356 = vmatpush3.bf16.msra.mxu1 %v388_v8 }
  0x31   :  { %337 = vmatprep.subr.bf16.mxu0 %v446_v0  ;;  %357 = vmatprep.subr.bf16.mxu1 %v446_v0 }
  0x34   :  { %338 = vmatpush3.bf16.msra.mxu0 %v380_v5  ;;  %358 = vmatpush3.bf16.msra.mxu1 %v389_v10 }
  0x35   :  { %339 = vmatprep.subr.bf16.mxu0 %v446_v0  ;;  %359 = vmatprep.subr.bf16.mxu1 %v446_v0 }
  0x38   :  { %340 = vmatpush3.bf16.msra.mxu0 %v381_v7  ;;  %360 = vmatpush3.bf16.msra.mxu1 %v390_v12 }
  0x39   :  { %341 = vmatprep.subr.bf16.mxu0 %v446_v0  ;;  %361 = vmatprep.subr.bf16.mxu1 %v446_v0 }
  0x3c   :  { %342 = vmatpush3.bf16.msra.mxu0 %v382_v9  ;;  %362 = vmatpush3.bf16.msra.mxu1 %v391_v14 }
  0x3d   :  { %343 = vmatprep.subr.bf16.mxu0 %v446_v0  ;;  %363 = vmatprep.subr.bf16.mxu1 %v446_v0 }
  0x40   :  { %344 = vmatpush3.bf16.msra.mxu0 %v383_v11  ;;  %364 = vmatpush3.bf16.msra.mxu1 %v392_v16 }
  0x41   :  { %345 = vmatprep.subr.bf16.mxu0 %v446_v0  ;;  %365 = vmatprep.subr.bf16.mxu1 %v446_v0 }
  0x44   :  { %346 = vmatpush3.bf16.msra.mxu0 %v384_v13  ;;  %366 = vmatpush3.bf16.msra.mxu1 %v393_v17 }
  0x47   :  { %348 = vmatmul.mubr.bf16.vlgmr.msra.gmra.mrb[0].mxu0 %v385_v15 }
 0x11a   :  { %v162_v19 = vpop.f32.mrb[0].mxu0 }
 0x11b   :  { %v163_v20 = vadd.f32 %v294_v18, %v162_v19  ;;  %v349_v21 = vpop.f32.mrb[1].mxu0 }
 0x11c   :  { %v165_v22 = vpop.f32.mrb[2].mxu0 }
 0x11d   :  { %v166_v23 = vadd.f32 %v294_v18, %v165_v22  ;;  %v350_v24 = vpop.f32.mrb[3].mxu0  ;;  %v169_v25 = vmax.f32 %v163_v20, 0.0 }
 0x11f   :  { %v170_v26 = vmax.f32 %v166_v23, 0.0 }
 0x121   :  { %v171_v27 = vpack.c.bf16 %v170_v26, %v169_v25 }
 0x123   :  { %368 = vmatmul.mubr.bf16.vlgmr.msra.gmra.mrb[0].mxu1 %v171_v27 }
 0x1f6   :  { %v277_v29 = vpop.f32.mrb[0].mxu1 }
 0x1f7   :  { %v278_v30 = vadd.f32 %v304_v28, %v277_v29  ;;  %v369_v31 = vpop.f32.mrb[1].mxu1 }
 0x1f8   :  { %v280_v32 = vpop.f32.mrb[2].mxu1 }
 0x1f9   :  { %v284_v33 = vmax.f32 %v278_v30, 0.0  ;;  %v281_v34 = vadd.f32 %v304_v28, %v280_v32  ;;  %v370_v35 = vpop.f32.mrb[3].mxu1 }
 0x1fb   :  { %286 = vst [vmem:[%s522_s5] sm:$0xff] %v284_v33  ;;  %v285_v36 = vmax.f32 %v281_v34, 0.0 }
 0x1fd   :  { %287 = vst [vmem:[%s522_s5 + $0x8] sm:$0xff] %v285_v36 }
 0x1fe   :  { %292 = vsyncpa [#allocation3], 1 }
 0x1ff   :  { %293 = vsyncpa [#allocation5], 1 }

</bundles_post_ra>
